<compile_context>
chip_gen: v7x
topology: tpu7x:2x2x1
jax: 0.10.0
libtpu: 0.0.40
codegen_flags: <defaults>
</compile_context>

<pallas_src>
import functools
import math

import jax
import jax.numpy as jnp
from jax import lax
from jax.experimental import pallas as pl
from jax.experimental.pallas import tpu as pltpu

_LANE = 128
_SUBLANE = 8


def _round_up(n, m):
    return ((n + m - 1) // m) * m


def _pad_axis(a, axis, target):
    pad = target - a.shape[axis]
    if pad <= 0:
        return a
    widths = [(0, 0)] * a.ndim
    widths[axis] = (0, pad)
    return jnp.pad(a, widths)


def _lmlif_layer_kernel(x_ref, w_ref, beta_ref, gamma_ref, bnb_ref, u0_ref,
                        o_ref, *, B, T, theta, cell_type, eps):
    """One channel tile of one LMLIFLayer.

    x_ref:    (T*Bp, Jp)  bf16  time-major input slab (resident across grid)
    w_ref:    (Jp, TN)    bf16  column tile of W^T
    beta_ref, gamma_ref, bnb_ref: (1, TN) f32
    u0_ref:   (Bp, TN)    f32   random membrane init (zero in padded rows)
    o_ref:    (T*Bp, TN)  bf16  spike output tile
    """
    Bp = u0_ref.shape[0]
    TN = w_ref.shape[1]

    # ---- 1) F.linear (bias-free): MXU matmul, f32 accumulate ----
    y = jnp.dot(x_ref[...], w_ref[...],
                preferred_element_type=jnp.float32)           # (T*Bp, TN)

    # ---- 2) BatchNorm1d batch stats (training mode, biased var) ----
    # Padded rows of x are all-zero => contribute 0 to s1/s2, so normalizing
    # with the REAL row count T*B is exact.
    inv_n = 1.0 / float(T * B)
    s1 = jnp.sum(y, axis=0, keepdims=True)
    s2 = jnp.sum(y * y, axis=0, keepdims=True)
    mean = s1 * inv_n
    var = jnp.maximum(s2 * inv_n - mean * mean, 0.0)
    inv_std = lax.rsqrt(var + eps)                            # EUP

    # ---- 3) fold BN affine + (1-beta) scaling into per-channel a, c ----
    beta = jax.nn.sigmoid(beta_ref[...])                      # (1, TN), EUP
    omb = 1.0 - beta
    a1 = omb * gamma_ref[...] * inv_std
    c1 = omb * (bnb_ref[...] - gamma_ref[...] * inv_std * mean)
    # hoisted broadcasts (JAX does not CSE broadcast_in_dim inside the loop)
    beta_b = jnp.broadcast_to(beta, (Bp, TN))
    a = jnp.broadcast_to(a1, (Bp, TN))
    c = jnp.broadcast_to(c1, (Bp, TN))

    # Per-row threshold: padded batch rows must never spike so that the padded
    # slab carried to the next layer stays exactly zero there.
    if B == Bp:
        thr = jnp.float32(theta)
    else:
        row_id = lax.broadcasted_iota(jnp.int32, (Bp, TN), 0)
        thr = jnp.where(row_id < B, jnp.float32(theta), jnp.float32(1e30))

    Ut = u0_ref[...]                                          # (Bp, TN) f32
    St = jnp.zeros((Bp, TN), jnp.float32)

    # ---- 4) recurrent LIF cell over T (unrolled; per-step aligned stores) ----
    if cell_type == "soft":
        bt = beta_b * theta                                   # hoisted
        for t in range(T):
            xt = y[t * Bp:(t + 1) * Bp, :]                    # tile-aligned slice
            Ut = beta_b * Ut - bt * St + a * xt + c
            # surrogate.ATan forward == Heaviside (>= 0); surrogate alters grads only
            St = (Ut >= thr).astype(jnp.float32)
            o_ref[t * Bp:(t + 1) * Bp, :] = St.astype(o_ref.dtype)
    elif cell_type == "hard":
        U0 = u0_ref[...]
        for t in range(T):
            xt = y[t * Bp:(t + 1) * Bp, :]
            Ut = beta_b * Ut + a * xt + c
            St = (Ut >= thr).astype(jnp.float32)
            Ut = (1.0 - St) * Ut + St * U0
            o_ref[t * Bp:(t + 1) * Bp, :] = St.astype(o_ref.dtype)
    else:
        raise ValueError(f"Unrecognized cell_type argument {cell_type}!")


def lmlif_layer_padded(x_tm, W, beta, gamma, bn_bias, U0, *, B, T,
                       threshold, cell_type, eps=1e-5):
    """One LMLIFLayer forward on a padded time-major slab.

    x_tm: (T*Bp, Jp) bf16 (row = t*Bp + b); W: (I, J); beta/gamma/bn_bias: (I,);
    U0: (B, I).  Returns (T*Bp, Ip) bf16 spike slab (zero in padded rows/lanes).
    """
    TBp, Jp = x_tm.shape
    Bp = TBp // T
    I, J = W.shape
    assert Jp == _round_up(max(J, _LANE), _LANE)
    Ip = _round_up(max(I, _LANE), _LANE)
    # 256-wide channel tiles when possible (fills v6e/v7x 256x256 MXU lanes).
    TN = 256 if (Ip % 256 == 0) else _LANE

    # wrapper-side layout plumbing: pre-transposed, lane-padded bf16 weight,
    # lane-padded per-channel vectors, sublane/lane-padded membrane init.
    Wt = _pad_axis(_pad_axis(jnp.transpose(W).astype(jnp.bfloat16), 0, Jp), 1, Ip)
    beta_p = _pad_axis(beta.reshape(1, I).astype(jnp.float32), 1, Ip)
    gamma_p = _pad_axis(gamma.reshape(1, I).astype(jnp.float32), 1, Ip)
    bnb_p = _pad_axis(bn_bias.reshape(1, I).astype(jnp.float32), 1, Ip)
    U0_p = _pad_axis(_pad_axis(U0.astype(jnp.float32), 0, Bp), 1, Ip)

    kernel = functools.partial(
        _lmlif_layer_kernel, B=B, T=T,
        theta=float(threshold), cell_type=cell_type, eps=float(eps))

    cost = pl.CostEstimate(
        flops=2 * TBp * Jp * Ip + 10 * TBp * Ip,
        transcendentals=2 * Ip,
        bytes_accessed=(TBp * Jp) * 2 + (Jp * Ip) * 2 + 4 * Ip * 4
                       + Bp * Ip * 4 + (TBp * Ip) * 2)

    out = pl.pallas_call(
        kernel,
        out_shape=jax.ShapeDtypeStruct((TBp, Ip), jnp.bfloat16),
        grid=(Ip // TN,),
        in_specs=[
            pl.BlockSpec((TBp, Jp), lambda i: (0, 0)),   # x slab stays resident
            pl.BlockSpec((Jp, TN), lambda i: (0, i)),    # W column tile
            pl.BlockSpec((1, TN), lambda i: (0, i)),     # beta
            pl.BlockSpec((1, TN), lambda i: (0, i)),     # BN gamma
            pl.BlockSpec((1, TN), lambda i: (0, i)),     # BN bias
            pl.BlockSpec((Bp, TN), lambda i: (0, i)),    # U0
        ],
        out_specs=pl.BlockSpec((TBp, TN), lambda i: (0, i)),
        compiler_params=pltpu.CompilerParams(
            dimension_semantics=("parallel",),           # channels independent
            vmem_limit_bytes=48 * 1024 * 1024),          # headroom on v7x 64MiB
        cost_estimate=cost,
    )(x_tm, Wt, beta_p, gamma_p, bnb_p, U0_p)
    return out


def init_lmlif_snn_params(key, *, input_dim, hidden_size, n_layers,
                          beta_init_min, beta_init_max):
    """Matches LMLIFLayer.__init: kaiming_uniform(a=sqrt(5)) on W ->
    U(-1/sqrt(fan_in), 1/sqrt(fan_in)); beta ~ U(beta_init_min, beta_init_max);
    BatchNorm affine at identity."""
    dims = []
    in_dim = input_dim
    for _ in range(1, n_layers):                 # non-readout layers
        dims.append((in_dim, hidden_size))
        in_dim = hidden_size
    dims.append((hidden_size, input_dim))        # readout layer

    params = []
    for (j, i) in dims:
        key, kw, kb = jax.random.split(key, 3)
        bound = 1.0 / math.sqrt(j)
        W = jax.random.uniform(kw, (i, j), jnp.float32, -bound, bound)
        beta = jax.random.uniform(kb, (i,), jnp.float32,
                                  beta_init_min, beta_init_max)
        gamma = jnp.ones((i,), jnp.float32)
        bn_bias = jnp.zeros((i,), jnp.float32)
        params.append((W, beta, gamma, bn_bias))
    return params


def lmlif_snn_forward(params, x, key, *, threshold, cell_type):
    """Equivalent of LMLIFSNN.search_forward / the LIF stack of forward().

    x: (B, T, J) float. Returns (B, T, input_dim) f32 spikes.
    The padded, time-major bf16 slab is carried through all layers; layout
    transpose / unpad happens exactly once at the start and end.
    """
    B, T, J = x.shape
    Bp = _round_up(max(B, _SUBLANE), _SUBLANE)
    Jp = _round_up(max(J, _LANE), _LANE)

    x_tm = jnp.transpose(x, (1, 0, 2)).astype(jnp.bfloat16)     # (T, B, J)
    x_tm = _pad_axis(_pad_axis(x_tm, 1, Bp), 2, Jp).reshape(T * Bp, Jp)

    for (W, beta, gamma, bn_bias) in params:
        key, ku = jax.random.split(key)
        I = W.shape[0]
        # RandomBatchwiseInit(0, 1): fresh uniform membrane init per layer call.
        U0 = jax.random.uniform(ku, (B, I), jnp.float32, 0.0, 1.0)
        x_tm = lmlif_layer_padded(x_tm, W, beta, gamma, bn_bias, U0,
                                  B=B, T=T, threshold=threshold,
                                  cell_type=cell_type)
        # nn.Dropout on non-readout layers: identity at inference.

    I_out = params[-1][0].shape[0]
    Ip_out = x_tm.shape[1]
    out = x_tm.reshape(T, Bp, Ip_out).transpose(1, 0, 2)[:B, :, :I_out]
    return out.astype(jnp.float32)


if __name__ == "__main__":
    # Small shapes consistent with the module: B=2, T=8 timesteps,
    # input_dim J=32, hidden_size I=32, n_layers=3.
    B, T, J, H, n_layers = 2, 8, 32, 32, 3
    threshold = 1.0
    cell_type = "soft"

    root = jax.random.PRNGKey(0)
    k_param, k_data, k_state = jax.random.split(root, 3)

    params = init_lmlif_snn_params(
        k_param, input_dim=J, hidden_size=H, n_layers=n_layers,
        beta_init_min=2.0, beta_init_max=6.0)

    # Binary spike-train input, layout (B, T, J). Spikes are exact in bf16.
    x = (jax.random.uniform(k_data, (B, T, J)) < 0.3).astype(jnp.float32)

    out = lmlif_snn_forward(params, x, k_state,
                            threshold=threshold, cell_type=cell_type)
    out = jax.block_until_ready(out)

    assert out.shape == (B, T, J)
    assert out.dtype == jnp.float32
    print("KERNEL_OK")
</pallas_src>

<mosaic_0001>
module attributes {stable_mosaic.version = 11 : i64} {
  func.func @_lmlif_layer_kernel(%arg0: i32, %arg1: memref<64x128xbf16, #tpu.memory_space<vmem>>, %arg2: memref<128x128xbf16, #tpu.memory_space<vmem>>, %arg3: memref<1x128xf32, #tpu.memory_space<vmem>>, %arg4: memref<1x128xf32, #tpu.memory_space<vmem>>, %arg5: memref<1x128xf32, #tpu.memory_space<vmem>>, %arg6: memref<8x128xf32, #tpu.memory_space<vmem>>, %arg7: memref<64x128xbf16, #tpu.memory_space<vmem>>) attributes {dimension_semantics = [#tpu.dimension_semantics<parallel>], iteration_bounds = array<i64: 1>, scalar_prefetch = 0 : i64, scratch_operands = 0 : i64, tpu.core_type = #tpu.core_type<tc>, window_params = [{pipeline_mode = #tpu.pipeline_mode<synchronous>, transform_indices = @transform_0, window_bounds = array<i64: 64, 128>}, {transform_indices = @transform_1, window_bounds = array<i64: 128, 128>}, {transform_indices = @transform_2, window_bounds = array<i64: 1, 128>}, {transform_indices = @transform_3, window_bounds = array<i64: 1, 128>}, {transform_indices = @transform_4, window_bounds = array<i64: 1, 128>}, {transform_indices = @transform_5, window_bounds = array<i64: 8, 128>}, {transform_indices = @transform_6, window_bounds = array<i64: 64, 128>}]} {
    %c0 = arith.constant 0 : index
    %c0_0 = arith.constant 0 : index
    %0 = vector.load %arg1[%c0, %c0_0] : memref<64x128xbf16, #tpu.memory_space<vmem>>, vector<64x128xbf16>
    %c0_1 = arith.constant 0 : index
    %c0_2 = arith.constant 0 : index
    %1 = vector.load %arg2[%c0_1, %c0_2] : memref<128x128xbf16, #tpu.memory_space<vmem>>, vector<128x128xbf16>
    %cst = arith.constant dense<0.000000e+00> : vector<64x128xf32>
    %2 = tpu.matmul %0, %1, %cst {dimension_numbers = #tpu.dot_dimension_numbers<[1], [0], [0], [1], [0, 0, 1, 1], [], []>} : vector<64x128xbf16>, vector<128x128xbf16>, vector<64x128xf32> -> vector<64x128xf32>
    %cst_3 = arith.constant dense<0.000000e+00> : vector<128xf32>
    %3 = vector.multi_reduction <add>, %2, %cst_3 [0] : vector<64x128xf32> to vector<128xf32>
    %4 = vector.shape_cast %3 : vector<128xf32> to vector<1x128xf32>
    %5 = arith.mulf %2, %2 : vector<64x128xf32>
    %cst_4 = arith.constant dense<0.000000e+00> : vector<128xf32>
    %6 = vector.multi_reduction <add>, %5, %cst_4 [0] : vector<64x128xf32> to vector<128xf32>
    %7 = vector.shape_cast %6 : vector<128xf32> to vector<1x128xf32>
    %cst_5 = arith.constant 6.250000e-02 : f32
    %8 = vector.broadcast %cst_5 : f32 to vector<1x128xf32>
    %9 = arith.mulf %4, %8 : vector<1x128xf32>
    %cst_6 = arith.constant 6.250000e-02 : f32
    %10 = vector.broadcast %cst_6 : f32 to vector<1x128xf32>
    %11 = arith.mulf %7, %10 : vector<1x128xf32>
    %12 = arith.mulf %9, %9 : vector<1x128xf32>
    %13 = arith.subf %11, %12 : vector<1x128xf32>
    %cst_7 = arith.constant 0.000000e+00 : f32
    %14 = vector.broadcast %cst_7 : f32 to vector<1x128xf32>
    %15 = arith.maximumf %13, %14 : vector<1x128xf32>
    %cst_8 = arith.constant 9.99999974E-6 : f32
    %16 = vector.broadcast %cst_8 : f32 to vector<1x128xf32>
    %17 = arith.addf %15, %16 : vector<1x128xf32>
    %18 = math.rsqrt %17 : vector<1x128xf32>
    %c0_9 = arith.constant 0 : index
    %c0_10 = arith.constant 0 : index
    %19 = vector.load %arg3[%c0_9, %c0_10] : memref<1x128xf32, #tpu.memory_space<vmem>>, vector<1x128xf32>
    %20 = arith.negf %19 : vector<1x128xf32>
    %21 = math.exp %20 : vector<1x128xf32>
    %cst_11 = arith.constant 1.000000e+00 : f32
    %22 = vector.broadcast %cst_11 : f32 to vector<1x128xf32>
    %23 = arith.addf %22, %21 : vector<1x128xf32>
    %24 = arith.divf %22, %23 : vector<1x128xf32>
    %cst_12 = arith.constant 1.000000e+00 : f32
    %25 = vector.broadcast %cst_12 : f32 to vector<1x128xf32>
    %26 = arith.subf %25, %24 : vector<1x128xf32>
    %c0_13 = arith.constant 0 : index
    %c0_14 = arith.constant 0 : index
    %27 = vector.load %arg4[%c0_13, %c0_14] : memref<1x128xf32, #tpu.memory_space<vmem>>, vector<1x128xf32>
    %28 = arith.mulf %26, %27 : vector<1x128xf32>
    %29 = arith.mulf %28, %18 : vector<1x128xf32>
    %c0_15 = arith.constant 0 : index
    %c0_16 = arith.constant 0 : index
    %30 = vector.load %arg5[%c0_15, %c0_16] : memref<1x128xf32, #tpu.memory_space<vmem>>, vector<1x128xf32>
    %c0_17 = arith.constant 0 : index
    %c0_18 = arith.constant 0 : index
    %31 = vector.load %arg4[%c0_17, %c0_18] : memref<1x128xf32, #tpu.memory_space<vmem>>, vector<1x128xf32>
    %32 = arith.mulf %31, %18 : vector<1x128xf32>
    %33 = arith.mulf %32, %9 : vector<1x128xf32>
    %34 = arith.subf %30, %33 : vector<1x128xf32>
    %35 = arith.mulf %26, %34 : vector<1x128xf32>
    %36 = vector.shape_cast %24 : vector<1x128xf32> to vector<1x128xf32>
    %37 = vector.broadcast %36 : vector<1x128xf32> to vector<8x128xf32>
    %38 = vector.shape_cast %29 : vector<1x128xf32> to vector<1x128xf32>
    %39 = vector.broadcast %38 : vector<1x128xf32> to vector<8x128xf32>
    %40 = vector.shape_cast %35 : vector<1x128xf32> to vector<1x128xf32>
    %41 = vector.broadcast %40 : vector<1x128xf32> to vector<8x128xf32>
    %42 = tpu.iota {dimensions = array<i32: 0>} : vector<8x128xi32>
    %c2_i32 = arith.constant 2 : i32
    %43 = vector.broadcast %c2_i32 : i32 to vector<8x128xi32>
    %44 = arith.cmpi slt, %42, %43 : vector<8x128xi32>
    %cst_19 = arith.constant 1.000000e+00 : f32
    %cst_20 = arith.constant 1.000000e+30 : f32
    %45 = vector.broadcast %cst_19 : f32 to vector<8x128xf32>
    %46 = vector.broadcast %cst_20 : f32 to vector<8x128xf32>
    %47 = arith.select %44, %45, %46 : vector<8x128xi1>, vector<8x128xf32>
    %c0_21 = arith.constant 0 : index
    %c0_22 = arith.constant 0 : index
    %48 = vector.load %arg6[%c0_21, %c0_22] : memref<8x128xf32, #tpu.memory_space<vmem>>, vector<8x128xf32>
    %cst_23 = arith.constant 0.000000e+00 : f32
    %49 = vector.broadcast %cst_23 : f32 to vector<8x128xf32>
    %cst_24 = arith.constant 1.000000e+00 : f32
    %50 = vector.broadcast %cst_24 : f32 to vector<8x128xf32>
    %51 = arith.mulf %37, %50 : vector<8x128xf32>
    %52 = vector.extract_strided_slice %2 {offsets = [0, 0], sizes = [8, 128], strides = [1, 1]} : vector<64x128xf32> to vector<8x128xf32>
    %53 = arith.mulf %37, %48 : vector<8x128xf32>
    %54 = arith.mulf %51, %49 : vector<8x128xf32>
    %55 = arith.subf %53, %54 : vector<8x128xf32>
    %56 = arith.mulf %39, %52 : vector<8x128xf32>
    %57 = arith.addf %55, %56 : vector<8x128xf32>
    %58 = arith.addf %57, %41 : vector<8x128xf32>
    %59 = arith.cmpf oge, %58, %47 : vector<8x128xf32>
    %60 = arith.extui %59 : vector<8x128xi1> to vector<8x128xi32>
    %61 = arith.sitofp %60 : vector<8x128xi32> to vector<8x128xf32>
    %62 = arith.truncf %61 : vector<8x128xf32> to vector<8x128xbf16>
    %c0_25 = arith.constant 0 : index
    %c0_26 = arith.constant 0 : index
    %63 = vector.load %arg7[%c0_25, %c0_26] : memref<64x128xbf16, #tpu.memory_space<vmem>>, vector<8x128xbf16>
    tpu.vector_store %arg7[%c0_25, %c0_26], %62 {strides = array<i32>} : memref<64x128xbf16, #tpu.memory_space<vmem>>, vector<8x128xbf16>,
    %64 = vector.extract_strided_slice %2 {offsets = [8, 0], sizes = [8, 128], strides = [1, 1]} : vector<64x128xf32> to vector<8x128xf32>
    %65 = arith.mulf %37, %58 : vector<8x128xf32>
    %66 = arith.mulf %51, %61 : vector<8x128xf32>
    %67 = arith.subf %65, %66 : vector<8x128xf32>
    %68 = arith.mulf %39, %64 : vector<8x128xf32>
    %69 = arith.addf %67, %68 : vector<8x128xf32>
    %70 = arith.addf %69, %41 : vector<8x128xf32>
    %71 = arith.cmpf oge, %70, %47 : vector<8x128xf32>
    %72 = arith.extui %71 : vector<8x128xi1> to vector<8x128xi32>
    %73 = arith.sitofp %72 : vector<8x128xi32> to vector<8x128xf32>
    %74 = arith.truncf %73 : vector<8x128xf32> to vector<8x128xbf16>
    %c8 = arith.constant 8 : index
    %c0_27 = arith.constant 0 : index
    %75 = vector.load %arg7[%c8, %c0_27] : memref<64x128xbf16, #tpu.memory_space<vmem>>, vector<8x128xbf16>
    tpu.vector_store %arg7[%c8, %c0_27], %74 {strides = array<i32>} : memref<64x128xbf16, #tpu.memory_space<vmem>>, vector<8x128xbf16>,
    %76 = vector.extract_strided_slice %2 {offsets = [16, 0], sizes = [8, 128], strides = [1, 1]} : vector<64x128xf32> to vector<8x128xf32>
    %77 = arith.mulf %37, %70 : vector<8x128xf32>
    %78 = arith.mulf %51, %73 : vector<8x128xf32>
    %79 = arith.subf %77, %78 : vector<8x128xf32>
    %80 = arith.mulf %39, %76 : vector<8x128xf32>
    %81 = arith.addf %79, %80 : vector<8x128xf32>
    %82 = arith.addf %81, %41 : vector<8x128xf32>
    %83 = arith.cmpf oge, %82, %47 : vector<8x128xf32>
    %84 = arith.extui %83 : vector<8x128xi1> to vector<8x128xi32>
    %85 = arith.sitofp %84 : vector<8x128xi32> to vector<8x128xf32>
    %86 = arith.truncf %85 : vector<8x128xf32> to vector<8x128xbf16>
    %c16 = arith.constant 16 : index
    %c0_28 = arith.constant 0 : index
    %87 = vector.load %arg7[%c16, %c0_28] : memref<64x128xbf16, #tpu.memory_space<vmem>>, vector<8x128xbf16>
    tpu.vector_store %arg7[%c16, %c0_28], %86 {strides = array<i32>} : memref<64x128xbf16, #tpu.memory_space<vmem>>, vector<8x128xbf16>,
    %88 = vector.extract_strided_slice %2 {offsets = [24, 0], sizes = [8, 128], strides = [1, 1]} : vector<64x128xf32> to vector<8x128xf32>
    %89 = arith.mulf %37, %82 : vector<8x128xf32>
    %90 = arith.mulf %51, %85 : vector<8x128xf32>
    %91 = arith.subf %89, %90 : vector<8x128xf32>
    %92 = arith.mulf %39, %88 : vector<8x128xf32>
    %93 = arith.addf %91, %92 : vector<8x128xf32>
    %94 = arith.addf %93, %41 : vector<8x128xf32>
    %95 = arith.cmpf oge, %94, %47 : vector<8x128xf32>
    %96 = arith.extui %95 : vector<8x128xi1> to vector<8x128xi32>
    %97 = arith.sitofp %96 : vector<8x128xi32> to vector<8x128xf32>
    %98 = arith.truncf %97 : vector<8x128xf32> to vector<8x128xbf16>
    %c24 = arith.constant 24 : index
    %c0_29 = arith.constant 0 : index
    %99 = vector.load %arg7[%c24, %c0_29] : memref<64x128xbf16, #tpu.memory_space<vmem>>, vector<8x128xbf16>
    tpu.vector_store %arg7[%c24, %c0_29], %98 {strides = array<i32>} : memref<64x128xbf16, #tpu.memory_space<vmem>>, vector<8x128xbf16>,
    %100 = vector.extract_strided_slice %2 {offsets = [32, 0], sizes = [8, 128], strides = [1, 1]} : vector<64x128xf32> to vector<8x128xf32>
    %101 = arith.mulf %37, %94 : vector<8x128xf32>
    %102 = arith.mulf %51, %97 : vector<8x128xf32>
    %103 = arith.subf %101, %102 : vector<8x128xf32>
    %104 = arith.mulf %39, %100 : vector<8x128xf32>
    %105 = arith.addf %103, %104 : vector<8x128xf32>
    %106 = arith.addf %105, %41 : vector<8x128xf32>
    %107 = arith.cmpf oge, %106, %47 : vector<8x128xf32>
    %108 = arith.extui %107 : vector<8x128xi1> to vector<8x128xi32>
    %109 = arith.sitofp %108 : vector<8x128xi32> to vector<8x128xf32>
    %110 = arith.truncf %109 : vector<8x128xf32> to vector<8x128xbf16>
    %c32 = arith.constant 32 : index
    %c0_30 = arith.constant 0 : index
    %111 = vector.load %arg7[%c32, %c0_30] : memref<64x128xbf16, #tpu.memory_space<vmem>>, vector<8x128xbf16>
    tpu.vector_store %arg7[%c32, %c0_30], %110 {strides = array<i32>} : memref<64x128xbf16, #tpu.memory_space<vmem>>, vector<8x128xbf16>,
    %112 = vector.extract_strided_slice %2 {offsets = [40, 0], sizes = [8, 128], strides = [1, 1]} : vector<64x128xf32> to vector<8x128xf32>
    %113 = arith.mulf %37, %106 : vector<8x128xf32>
    %114 = arith.mulf %51, %109 : vector<8x128xf32>
    %115 = arith.subf %113, %114 : vector<8x128xf32>
    %116 = arith.mulf %39, %112 : vector<8x128xf32>
    %117 = arith.addf %115, %116 : vector<8x128xf32>
    %118 = arith.addf %117, %41 : vector<8x128xf32>
    %119 = arith.cmpf oge, %118, %47 : vector<8x128xf32>
    %120 = arith.extui %119 : vector<8x128xi1> to vector<8x128xi32>
    %121 = arith.sitofp %120 : vector<8x128xi32> to vector<8x128xf32>
    %122 = arith.truncf %121 : vector<8x128xf32> to vector<8x128xbf16>
    %c40 = arith.constant 40 : index
    %c0_31 = arith.constant 0 : index
    %123 = vector.load %arg7[%c40, %c0_31] : memref<64x128xbf16, #tpu.memory_space<vmem>>, vector<8x128xbf16>
    tpu.vector_store %arg7[%c40, %c0_31], %122 {strides = array<i32>} : memref<64x128xbf16, #tpu.memory_space<vmem>>, vector<8x128xbf16>,
    %124 = vector.extract_strided_slice %2 {offsets = [48, 0], sizes = [8, 128], strides = [1, 1]} : vector<64x128xf32> to vector<8x128xf32>
    %125 = arith.mulf %37, %118 : vector<8x128xf32>
    %126 = arith.mulf %51, %121 : vector<8x128xf32>
    %127 = arith.subf %125, %126 : vector<8x128xf32>
    %128 = arith.mulf %39, %124 : vector<8x128xf32>
    %129 = arith.addf %127, %128 : vector<8x128xf32>
    %130 = arith.addf %129, %41 : vector<8x128xf32>
    %131 = arith.cmpf oge, %130, %47 : vector<8x128xf32>
    %132 = arith.extui %131 : vector<8x128xi1> to vector<8x128xi32>
    %133 = arith.sitofp %132 : vector<8x128xi32> to vector<8x128xf32>
    %134 = arith.truncf %133 : vector<8x128xf32> to vector<8x128xbf16>
    %c48 = arith.constant 48 : index
    %c0_32 = arith.constant 0 : index
    %135 = vector.load %arg7[%c48, %c0_32] : memref<64x128xbf16, #tpu.memory_space<vmem>>, vector<8x128xbf16>
    tpu.vector_store %arg7[%c48, %c0_32], %134 {strides = array<i32>} : memref<64x128xbf16, #tpu.memory_space<vmem>>, vector<8x128xbf16>,
    %136 = vector.extract_strided_slice %2 {offsets = [56, 0], sizes = [8, 128], strides = [1, 1]} : vector<64x128xf32> to vector<8x128xf32>
    %137 = arith.mulf %37, %130 : vector<8x128xf32>
    %138 = arith.mulf %51, %133 : vector<8x128xf32>
    %139 = arith.subf %137, %138 : vector<8x128xf32>
    %140 = arith.mulf %39, %136 : vector<8x128xf32>
    %141 = arith.addf %139, %140 : vector<8x128xf32>
    %142 = arith.addf %141, %41 : vector<8x128xf32>
    %143 = arith.cmpf oge, %142, %47 : vector<8x128xf32>
    %144 = arith.extui %143 : vector<8x128xi1> to vector<8x128xi32>
    %145 = arith.sitofp %144 : vector<8x128xi32> to vector<8x128xf32>
    %146 = arith.truncf %145 : vector<8x128xf32> to vector<8x128xbf16>
    %c56 = arith.constant 56 : index
    %c0_33 = arith.constant 0 : index
    %147 = vector.load %arg7[%c56, %c0_33] : memref<64x128xbf16, #tpu.memory_space<vmem>>, vector<8x128xbf16>
    tpu.vector_store %arg7[%c56, %c0_33], %146 {strides = array<i32>} : memref<64x128xbf16, #tpu.memory_space<vmem>>, vector<8x128xbf16>,
    return
  }
  func.func @transform_0(%arg0: i32) -> (i32, i32) {
    %c0_i32 = arith.constant 0 : i32
    %c0_i32_0 = arith.constant 0 : i32
    %c0_i32_1 = arith.constant 0 : i32
    return %c0_i32, %c0_i32_0 : i32, i32
  }
  func.func @transform_1(%arg0: i32) -> (i32, i32) {
    %c0_i32 = arith.constant 0 : i32
    %c0_i32_0 = arith.constant 0 : i32
    return %c0_i32, %arg0 : i32, i32
  }
  func.func @transform_2(%arg0: i32) -> (i32, i32) {
    %c0_i32 = arith.constant 0 : i32
    %c0_i32_0 = arith.constant 0 : i32
    return %c0_i32, %arg0 : i32, i32
  }
  func.func @transform_3(%arg0: i32) -> (i32, i32) {
    %c0_i32 = arith.constant 0 : i32
    %c0_i32_0 = arith.constant 0 : i32
    return %c0_i32, %arg0 : i32, i32
  }
  func.func @transform_4(%arg0: i32) -> (i32, i32) {
    %c0_i32 = arith.constant 0 : i32
    %c0_i32_0 = arith.constant 0 : i32
    return %c0_i32, %arg0 : i32, i32
  }
  func.func @transform_5(%arg0: i32) -> (i32, i32) {
    %c0_i32 = arith.constant 0 : i32
    %c0_i32_0 = arith.constant 0 : i32
    return %c0_i32, %arg0 : i32, i32
  }
  func.func @transform_6(%arg0: i32) -> (i32, i32) {
    %c0_i32 = arith.constant 0 : i32
    %c0_i32_0 = arith.constant 0 : i32
    return %c0_i32, %arg0 : i32, i32
  }
}

</mosaic_0001>

<bundles_post_ra>
// kernel: tpu_custom_call.1
= control target key start
LH: loop header
LB: loop body
LE: loop exit
PB: predicated region body
PF: predicated region fallthrough
CT: control target
= control target key end

     0   :  { %11 = vsyncpa [#allocation3], 0  ;;  %s766_s0 = inlined_call_operand.hbm [shape: bf16[64,128], index: 0, kind: input, shape index: {}]   ;;  %s767_s1 = inlined_call_operand.hbm [shape: bf16[128,128], index: 1, kind: input, shape index: {}]   ;;  %s768_s2 = inlined_call_operand.vmem [shape: f32[1,128], index: 2, kind: input, shape index: {}]   ;;  %s769_s3 = inlined_call_operand.vmem [shape: f32[1,128], index: 3, kind: input, shape index: {}]   ;;  %s770_s4 = inlined_call_operand.vmem [shape: f32[1,128], index: 4, kind: input, shape index: {}]   ;;  %s771_s5 = inlined_call_operand.vmem [shape: f32[8,128], index: 5, kind: input, shape index: {}]   ;;  %s772_s6 = inlined_call_operand.hbm [shape: bf16[64,128], index: 6, kind: output, shape index: {}]  }
   0x1   :  { %12 = vsyncpa [#allocation6], 0 }
   0x2   :  { %13 = vsyncpa [#allocation4], 0  ;;  %s570_s21 = smov [#allocation2]   ;;  %s498_s25 = scalar_lea.hbm %s766_s0, 512 }
   0x3   :  { %s19_s22 = sshll.u32 %s570_s21, 4  ;;  %p499_p0 = scmp.ne.s32.totalorder %s766_s0, %s498_s25  ;;  %s20_s22 = int_to_ptr.vmem [resolvable:$true] %s19_s22 }
   0x4   :  { %p502_p1 = scmp.lt.u32.totalorder %s498_s25, %s766_s0 }
   0x6   :  { %p504_p2 = pnand %p502_p1, %p499_p0 }
   0x8   :  { %507 = shalt.err (!%p504_p2)
}
   0x9   :  { %s508_s30 = scalar_lea.vmem %s20_s22, 512  ;;  %p513_p4 = scmp.lt.s32.totalorder %s20_s22, %s20_s22 }
   0xa   :  { %p509_p3 = scmp.ne.s32.totalorder %s20_s22, %s508_s30  ;;  %p514_p5 = scmp.lt.s32.totalorder %s508_s30, %s508_s30 }
   0xc   :  { %p515_p6 = por %p514_p5, %p513_p4 }
   0xe   :  { %p516_p7 = pnand %p515_p6, %p509_p3 }
  0x10   :  { %519 = shalt.err (!%p516_p7)
}
  0x11   :  { %s571_s7 = smov 64   ;;  %s572_s8 = smov 4  }
  0x12   :  { %25 = dma.hbm_to_vmem [thread:$0]  %s766_s0, 512, %s20_s22, [#allocation3], %s571_s7, %s571_s7, %s572_s8  }
  0x13   :  { %s573_s11 = smov [#allocation5]   ;;  %s520_s15 = scalar_lea.hbm %s767_s1, 1024 }
  0x14   :  { %s31_s12 = sshll.u32 %s573_s11, 4  ;;  %p521_p8 = scmp.ne.s32.totalorder %s767_s1, %s520_s15  ;;  %s32_s12 = int_to_ptr.vmem [resolvable:$true] %s31_s12 }
  0x15   :  { %p524_p9 = scmp.lt.u32.totalorder %s520_s15, %s767_s1 }
  0x17   :  { %p526_p10 = pnand %p524_p9, %p521_p8 }
  0x19   :  { %529 = shalt.err (!%p526_p10)
}
  0x1a   :  { %s530_s20 = scalar_lea.vmem %s32_s12, 1024  ;;  %p535_p12 = scmp.lt.s32.totalorder %s32_s12, %s32_s12 }
  0x1b   :  { %p531_p11 = scmp.ne.s32.totalorder %s32_s12, %s530_s20  ;;  %p536_p13 = scmp.lt.s32.totalorder %s530_s20, %s530_s20 }
  0x1d   :  { %p537_p0 = por %p536_p13, %p535_p12 }
  0x1f   :  { %p538_p1 = pnand %p537_p0, %p531_p11 }
  0x21   :  { %541 = shalt.err (!%p538_p1)
}
  0x22   :  { %37 = dma.hbm_to_vmem [thread:$0]  %s767_s1, 1024, %s32_s12, [#allocation6], %s571_s7, %s571_s7, %s572_s8  }
  0x23   :  { %564 = dma.done.wait [#allocation3], 512  }
  0x24   :  { %565 = vsyncadd [#allocation3], 4294966784 }
  0x25   :  { %566 = dma.done.wait [#allocation6], 1024  }
  0x26   :  { %567 = vsyncadd [#allocation6], 4294966272  ;;  %v480_v0 = vld [vmem:[#allocation5] sm:$0xff]   ;;  %v481_v1 = vld [vmem:[#allocation5 + $0x8] sm:$0xff]   ;;  %v272_v62 = vlaneseq }
  0x27   :  { %433 = vmatprep.subr.bf16.mxu0 %v480_v0  ;;  %457 = vmatprep.subr.bf16.mxu1 %v480_v0  ;;  %v482_v2 = vld [vmem:[#allocation5 + $0x10] sm:$0xff]   ;;  %v483_v3 = vld [vmem:[#allocation5 + $0x18] sm:$0xff]   ;;  %v488_v4 = vld [vmem:[#allocation2] sm:$0xff]  }
  0x28   :  { %434 = vmatpush3.bf16.msra.mxu0 %v480_v0  ;;  %465 = vmatpush3.bf16.msra.mxu1 %v480_v0  ;;  %v490_v5 = vld [vmem:[#allocation2 + $0x10] sm:$0xff]   ;;  %v484_v6 = vld [vmem:[#allocation5 + $0x20] sm:$0xff]   ;;  %v485_v7 = vld [vmem:[#allocation5 + $0x28] sm:$0xff]  }
  0x29   :  { %435 = vmatprep.subr.bf16.mxu0 %v481_v1  ;;  %458 = vmatprep.subr.bf16.mxu1 %v481_v1  ;;  %v486_v8 = vld [vmem:[#allocation5 + $0x30] sm:$0xff]   ;;  %v487_v9 = vld [vmem:[#allocation5 + $0x38] sm:$0xff]   ;;  %v489_v10 = vld [vmem:[#allocation2 + $0x8] sm:$0xff]  }
  0x2a   :  { %449 = vmatprep.mubr.bf16.mxu0 %v488_v4  ;;  %453 = vmatprep.mubr.bf16.mxu1 %v490_v5  ;;  %v491_v11 = vld [vmem:[#allocation2 + $0x18] sm:$0xff]   ;;  %v255_v26 = vld [vmem:[%s768_s2] sm:$0x1] }
  0x2b   :  { %v412_v31 = vmul.f32 -1.442695, %v255_v26  ;;  %v263_v5 = vld [vmem:[%s769_s3] sm:$0x1]  ;;  %s576_s3 = smov [#allocation7]  }
  0x2c   :  { %436 = vmatpush3.bf16.msra.mxu0 %v481_v1  ;;  %466 = vmatpush3.bf16.msra.mxu1 %v481_v1  ;;  %v273_v1 = vshrl.u32 %v272_v62, 7 }
  0x2d   :  { %437 = vmatprep.subr.bf16.mxu0 %v482_v2  ;;  %459 = vmatprep.subr.bf16.mxu1 %v482_v2  ;;  %492 = vpow2.f32 %v412_v31 }
  0x2e   :  { %vm291_vm0 = vcmp.lt.s32.totalorder %v273_v1, 2 }
  0x30   :  { %438 = vmatpush3.bf16.msra.mxu0 %v482_v2  ;;  %467 = vmatpush3.bf16.msra.mxu1 %v482_v2 }
  0x31   :  { %439 = vmatprep.subr.bf16.mxu0 %v483_v3  ;;  %460 = vmatprep.subr.bf16.mxu1 %v483_v3 }
  0x34   :  { %440 = vmatpush3.bf16.msra.mxu0 %v483_v3  ;;  %468 = vmatpush3.bf16.msra.mxu1 %v483_v3  ;;  %v274_v3 = vsub.s32 0, %v273_v1 }
  0x35   :  { %441 = vmatprep.subr.bf16.mxu0 %v484_v6  ;;  %461 = vmatprep.subr.bf16.mxu1 %v484_v6 }
  0x37   :  { %v493_v49 = vpop.eup %492 }
  0x38   :  { %442 = vmatpush3.bf16.msra.mxu0 %v484_v6  ;;  %469 = vmatpush3.bf16.msra.mxu1 %v484_v6  ;;  %v259_v54 = vadd.f32 1.0, %v493_v49 }
  0x39   :  { %443 = vmatprep.subr.bf16.mxu0 %v485_v7  ;;  %462 = vmatprep.subr.bf16.mxu1 %v485_v7 }
  0x3a   :  { %494 = vrcp.f32 %v259_v54 }
  0x3c   :  { %444 = vmatpush3.bf16.msra.mxu0 %v485_v7  ;;  %470 = vmatpush3.bf16.msra.mxu1 %v485_v7 }
  0x3d   :  { %445 = vmatprep.subr.bf16.mxu0 %v486_v8  ;;  %463 = vmatprep.subr.bf16.mxu1 %v486_v8 }
  0x40   :  { %446 = vmatpush3.bf16.msra.mxu0 %v486_v8  ;;  %471 = vmatpush3.bf16.msra.mxu1 %v486_v8  ;;  %v293_v8 = vld [vmem:[%s771_s5] sm:$0xff] }
  0x41   :  { %447 = vmatprep.subr.bf16.mxu0 %v487_v9  ;;  %464 = vmatprep.subr.bf16.mxu1 %v487_v9 }
  0x44   :  { %448 = vmatpush3.bf16.msra.mxu0 %v487_v9  ;;  %472 = vmatpush3.bf16.msra.mxu1 %v487_v9  ;;  %v495_v2 = vpop.eup %494 }
  0x45   :  { %v262_v4 = vsub.f32 1.0, %v495_v2  ;;  %v688_v6 = vrot.slane %v495_v2, %v274_v3 }
  0x47   :  { %450 = vmatmul.mubr.bf16.vlgmr.msra.gmra.mrb[0].mxu0 %v489_v10  ;;  %454 = vmatmul.mubr.bf16.vlgmr.msra.gmra.mrb[0].mxu1 %v491_v11  ;;  %v264_v7 = vmul.f32 %v263_v5, %v262_v4  ;;  %v294_v10 = vmul.f32 %v293_v8, %v688_v6  ;;  %v295_v11 = vmul.f32 0.0, %v688_v6 }
 0x11a   :  { %v642_v12 = vpop.f32.mrb[0].mxu0  ;;  %v644_v13 = vpop.f32.mrb[0].mxu1 }
 0x11b   :  { %v646_v14 = vpop.f32.mrb[1].mxu0  ;;  %v648_v15 = vpop.f32.mrb[1].mxu1  ;;  %v229_v23 = vmul.f32 %v642_v12, %v642_v12  ;;  %v233_v37 = vmul.f32 %v644_v13, %v644_v13 }
 0x11c   :  { %v650_v16 = vpop.f32.mrb[2].mxu0  ;;  %v652_v17 = vpop.f32.mrb[2].mxu1  ;;  %v227_v20 = vmul.f32 %v646_v14, %v646_v14  ;;  %v231_v30 = vmul.f32 %v648_v15, %v648_v15 }
 0x11d   :  { %v654_v18 = vpop.f32.mrb[3].mxu0  ;;  %v656_v19 = vpop.f32.mrb[3].mxu1  ;;  %v230_v27 = vmul.f32 %v650_v16, %v650_v16  ;;  %v234_v40 = vmul.f32 %v652_v17, %v652_v17 }
 0x11e   :  { %v214_v21 = vadd.f32 %v654_v18, %v646_v14  ;;  %v228_v22 = vmul.f32 %v654_v18, %v654_v18  ;;  %v232_v36 = vmul.f32 %v656_v19, %v656_v19 }
 0x120   :  { %v215_v24 = vadd.f32 %v642_v12, %v214_v21  ;;  %v235_v25 = vadd.f32 %v228_v22, %v227_v20  ;;  %v266_v22 = vld [vmem:[%s770_s4] sm:$0x1]  ;;  %s387_s4 = sshll.u32 %s576_s3, 4  ;;  %s388_s4 = int_to_ptr.vmem [resolvable:$true] %s387_s4 }
 0x121   :  { %s542_s5 = scalar_lea.vmem %s388_s4, 512  ;;  %p547_p3 = scmp.lt.s32.totalorder %s388_s4, %s388_s4 }
 0x122   :  { %v236_v28 = vadd.f32 %v235_v25, %v229_v23  ;;  %v216_v29 = vadd.f32 %v650_v16, %v215_v24  ;;  %v296_v25 = vsub.f32 %v294_v10, %v295_v11  ;;  %p543_p2 = scmp.ne.s32.totalorder %s388_s4, %s542_s5  ;;  %p548_p4 = scmp.lt.s32.totalorder %s542_s5, %s542_s5 }
 0x124   :  { %v217_v32 = vadd.f32 %v216_v29, %v648_v15  ;;  %v237_v33 = vadd.f32 %v236_v28, %v230_v27  ;;  %p549_p5 = por %p548_p4, %p547_p3 }
 0x126   :  { %v238_v34 = vadd.f32 %v237_v33, %v231_v30  ;;  %v218_v35 = vadd.f32 %v217_v32, %v656_v19  ;;  %p550_p6 = pnand %p549_p5, %p543_p2 }
 0x128   :  { %v219_v38 = vadd.f32 %v644_v13, %v218_v35  ;;  %v239_v39 = vadd.f32 %v238_v34, %v232_v36 }
 0x12a   :  { %v220_v41 = vadd.f32 %v652_v17, %v219_v38  ;;  %v240_v42 = vadd.f32 %v239_v39, %v233_v37  ;;  %v574_v37 = vmov 1e+30  }
 0x12c   :  { %v221_v43 = vrot.slane %v220_v41, 4  ;;  %v241_v44 = vadd.f32 %v240_v42, %v234_v40 }
 0x12e   :  { %v222_v45 = vadd.f32 %v221_v43, %v220_v41  ;;  %v242_v46 = vrot.slane %v241_v44, 4 }
 0x130   :  { %v223_v47 = vrot.slane %v222_v45, 2  ;;  %v243_v48 = vadd.f32 %v242_v46, %v241_v44 }
 0x132   :  { %v224_v50 = vadd.f32 %v223_v47, %v222_v45  ;;  %v244_v51 = vrot.slane %v243_v48, 2 }
 0x134   :  { %v225_v52 = vrot.slane %v224_v50, 1  ;;  %v245_v53 = vadd.f32 %v244_v51, %v243_v48 }
 0x136   :  { %v226_v55 = vadd.f32 %v225_v52, %v224_v50  ;;  %v246_v56 = vrot.slane %v245_v53, 1 }
 0x138   :  { %v247_v57 = vadd.f32 %v246_v56, %v245_v53  ;;  %v248_v58 = vmul.f32 0.0625, %v226_v55 }
 0x13a   :  { %v249_v59 = vmul.f32 0.0625, %v247_v57  ;;  %v250_v60 = vmul.f32 %v248_v58, %v248_v58 }
 0x13c   :  { %v251_v61 = vsub.f32 %v249_v59, %v250_v60 }
 0x13e   :  { %v252_v63 = vmax.f32 %v251_v61, 0.0 }
 0x140   :  { %v253_v0 = vadd.f32 1e-05, %v252_v63 }
 0x142   :  { %496 = vrsqrt.f32 %v253_v0 }
 0x14c   :  { %v497_v9 = vpop.eup %496 }
 0x14d   :  { %v265_v20 = vmul.f32 %v497_v9, %v264_v7  ;;  %v267_v21 = vmul.f32 %v497_v9, %v263_v5 }
 0x14f   :  { %v268_v23 = vmul.f32 %v267_v21, %v248_v58  ;;  %v281_v24 = vrot.slane %v265_v20, %v274_v3 }
 0x151   :  { %v269_v26 = vsub.f32 %v266_v22, %v268_v23  ;;  %v297_v27 = vmul.f32 %v281_v24, %v646_v14  ;;  %v308_v28 = vmul.f32 %v281_v24, %v654_v18  ;;  %v319_v29 = vmul.f32 %v642_v12, %v281_v24 }
 0x152   :  { %v330_v30 = vmul.f32 %v650_v16, %v281_v24  ;;  %v341_v31 = vmul.f32 %v281_v24, %v648_v15  ;;  %v352_v32 = vmul.f32 %v281_v24, %v656_v19  ;;  %v363_v33 = vmul.f32 %v644_v13, %v281_v24 }
 0x153   :  { %v270_v34 = vmul.f32 %v269_v26, %v262_v4  ;;  %v706_v35 = vmul.f32 %v652_v17, %v281_v24  ;;  %v298_v14 = vadd.f32 %v297_v27, %v296_v25  ;;  %v710_v18 = vsel %vm291_vm0, 1.0, %v574_v37 }
 0x154   :  { %v575_v15 = vmov 0.0  }
 0x155   :  { %v708_v36 = vrot.slane %v270_v34, %v274_v3 }
 0x157   :  { %v299_v12 = vadd.f32 %v298_v14, %v708_v36 }
 0x159   :  { %vm300_vm1 = vcmp.ge.f32.partialorder %v299_v12, %v710_v18  ;;  %v305_v13 = vmul.f32 %v299_v12, %v688_v6 }
 0x15a   :  { %v413_v16 = vsel %vm300_vm1, 1.0, %v575_v15 }
 0x15b   :  { %v306_v19 = vmul.f32 %v413_v16, %v688_v6  ;;  %v303_v38 = vpack.c.bf16 %v413_v16, %v413_v16 }
 0x15d   :  { %v307_v17 = vsub.f32 %v305_v13, %v306_v19  ;;  %304 = vst [vmem:[#allocation7] sm:$0xf] %v303_v38 }
 0x15f   :  { %v309_v39 = vadd.f32 %v308_v28, %v307_v17 }
 0x161   :  { %v310_v40 = vadd.f32 %v309_v39, %v708_v36 }
 0x163   :  { %vm311_vm2 = vcmp.ge.f32.partialorder %v310_v40, %v710_v18  ;;  %v316_v42 = vmul.f32 %v310_v40, %v688_v6 }
 0x164   :  { %v414_v41 = vsel %vm311_vm2, 1.0, %v575_v15 }
 0x165   :  { %v317_v43 = vmul.f32 %v414_v41, %v688_v6  ;;  %v314_v44 = vpack.c.bf16 %v414_v41, %v414_v41 }
 0x167   :  { %v318_v45 = vsub.f32 %v316_v42, %v317_v43  ;;  %315 = vst [vmem:[#allocation7 + $0x4] sm:$0xf] %v314_v44 }
 0x169   :  { %v320_v46 = vadd.f32 %v319_v29, %v318_v45 }
 0x16b   :  { %v321_v47 = vadd.f32 %v320_v46, %v708_v36 }
 0x16d   :  { %vm322_vm3 = vcmp.ge.f32.partialorder %v321_v47, %v710_v18  ;;  %v327_v50 = vmul.f32 %v321_v47, %v688_v6 }
 0x16e   :  { %v415_v48 = vsel %vm322_vm3, 1.0, %v575_v15 }
 0x16f   :  { %v325_v49 = vpack.c.bf16 %v415_v48, %v415_v48  ;;  %v328_v51 = vmul.f32 %v415_v48, %v688_v6 }
 0x171   :  { %v329_v52 = vsub.f32 %v327_v50, %v328_v51  ;;  %326 = vst [vmem:[#allocation7 + $0x8] sm:$0xf] %v325_v49 }
 0x173   :  { %v331_v53 = vadd.f32 %v330_v30, %v329_v52 }
 0x175   :  { %v332_v54 = vadd.f32 %v331_v53, %v708_v36 }
 0x177   :  { %vm333_vm4 = vcmp.ge.f32.partialorder %v332_v54, %v710_v18  ;;  %v338_v57 = vmul.f32 %v332_v54, %v688_v6 }
 0x178   :  { %v416_v55 = vsel %vm333_vm4, 1.0, %v575_v15 }
 0x179   :  { %v336_v56 = vpack.c.bf16 %v416_v55, %v416_v55  ;;  %v339_v58 = vmul.f32 %v416_v55, %v688_v6 }
 0x17b   :  { %337 = vst [vmem:[#allocation7 + $0xc] sm:$0xf] %v336_v56  ;;  %v340_v59 = vsub.f32 %v338_v57, %v339_v58 }
 0x17d   :  { %v342_v60 = vadd.f32 %v341_v31, %v340_v59 }
 0x17f   :  { %v343_v61 = vadd.f32 %v342_v60, %v708_v36 }
 0x181   :  { %vm344_vm5 = vcmp.ge.f32.partialorder %v343_v61, %v710_v18  ;;  %v349_v0 = vmul.f32 %v343_v61, %v688_v6 }
 0x182   :  { %v417_v62 = vsel %vm344_vm5, 1.0, %v575_v15 }
 0x183   :  { %v347_v63 = vpack.c.bf16 %v417_v62, %v417_v62  ;;  %v350_v1 = vmul.f32 %v417_v62, %v688_v6 }
 0x185   :  { %348 = vst [vmem:[#allocation7 + $0x10] sm:$0xf] %v347_v63  ;;  %v351_v2 = vsub.f32 %v349_v0, %v350_v1 }
 0x187   :  { %v353_v3 = vadd.f32 %v352_v32, %v351_v2 }
 0x189   :  { %v354_v4 = vadd.f32 %v353_v3, %v708_v36 }
 0x18b   :  { %vm355_vm6 = vcmp.ge.f32.partialorder %v354_v4, %v710_v18  ;;  %v360_v8 = vmul.f32 %v354_v4, %v688_v6 }
 0x18c   :  { %v418_v5 = vsel %vm355_vm6, 1.0, %v575_v15 }
 0x18d   :  { %v358_v7 = vpack.c.bf16 %v418_v5, %v418_v5  ;;  %v361_v9 = vmul.f32 %v418_v5, %v688_v6 }
 0x18f   :  { %359 = vst [vmem:[#allocation7 + $0x14] sm:$0xf] %v358_v7  ;;  %v362_v10 = vsub.f32 %v360_v8, %v361_v9 }
 0x191   :  { %v364_v11 = vadd.f32 %v363_v33, %v362_v10 }
 0x193   :  { %v365_v20 = vadd.f32 %v364_v11, %v708_v36 }
 0x195   :  { %vm366_vm7 = vcmp.ge.f32.partialorder %v365_v20, %v710_v18  ;;  %v371_v23 = vmul.f32 %v365_v20, %v688_v6 }
 0x196   :  { %v419_v21 = vsel %vm366_vm7, 1.0, %v575_v15 }
 0x197   :  { %v369_v22 = vpack.c.bf16 %v419_v21, %v419_v21  ;;  %v372_v24 = vmul.f32 %v419_v21, %v688_v6 }
 0x199   :  { %370 = vst [vmem:[#allocation7 + $0x18] sm:$0xf] %v369_v22  ;;  %v373_v25 = vsub.f32 %v371_v23, %v372_v24 }
 0x19b   :  { %v375_v26 = vadd.f32 %v706_v35, %v373_v25 }
 0x19d   :  { %v376_v27 = vadd.f32 %v375_v26, %v708_v36 }
 0x19f   :  { %vm377_vm8 = vcmp.ge.f32.partialorder %v376_v27, %v710_v18 }
 0x1a0   :  { %v420_v28 = vsel %vm377_vm8, 1.0, %v575_v15 }
 0x1a1   :  { %v380_v29 = vpack.c.bf16 %v420_v28, %v420_v28 }
 0x1a3   :  { %381 = vst [vmem:[#allocation7 + $0x1c] sm:$0xf] %v380_v29 }
 0x1a4   :  { %553 = shalt.err (!%p550_p6)
}
 0x1a5   :  { %s554_s30 = scalar_lea.hbm %s772_s6, 512 }
 0x1a6   :  { %p555_p7 = scmp.ne.s32.totalorder %s772_s6, %s554_s30  ;;  %p558_p8 = scmp.lt.u32.totalorder %s554_s30, %s772_s6 }
 0x1a8   :  { %p560_p9 = pnand %p558_p8, %p555_p7 }
 0x1aa   :  { %563 = shalt.err (!%p560_p9)
}
 0x1ab   :  { %393 = dma.vmem_to_hbm [thread:$0]  %s388_s4, 512, %s772_s6, [#allocation4], %s571_s7, %s571_s7, %s572_s8  }
 0x1ac   :  { %568 = dma.done.wait [#allocation4], 512  }
 0x1ad   :  { %569 = vsyncadd [#allocation4], 4294966784 }
 0x1ae   :  { %397 = vsyncpa [#allocation3], 1 }
 0x1af   :  { %398 = vsyncpa [#allocation6], 1 }
 0x1b0   :  { %399 = vsyncpa [#allocation4], 1 }

</bundles_post_ra>
